<compile_context>
chip_gen: v7x
topology: tpu7x:2x2x1
jax: 0.10.0
libtpu: 0.0.40
codegen_flags: <defaults>
</compile_context>

<pallas_src>
import functools

import jax
import jax.numpy as jnp
from jax.experimental import pallas as pl
from jax.experimental.pallas import tpu as pltpu


def _decoder_kernel(x_ref, w_scale_ref, w_dropout_ref, lib_ref,
                    px_scale_ref, px_rate_ref, px_dropout_ref, *, n_valid):
    x = x_ref[...]                                            # (TB, n_in_total) f32

    # Dropout head: MXU matmul straight into its output ref (no live intermediate kept).
    px_dropout_ref[...] = jnp.dot(
        x, w_dropout_ref[...],
        preferred_element_type=jnp.float32,
        precision=jax.lax.Precision.HIGHEST,
    ).astype(px_dropout_ref.dtype)

    # Scale head + numerically stable softmax over genes (f32 throughout).
    raw = jnp.dot(
        x, w_scale_ref[...],
        preferred_element_type=jnp.float32,
        precision=jax.lax.Precision.HIGHEST,
    )
    if n_valid != raw.shape[-1]:
        # Gene dim was padded up to a 128-lane multiple: exclude padded lanes from softmax.
        col = jax.lax.broadcasted_iota(jnp.int32, raw.shape, 1)
        raw = jnp.where(col < n_valid, raw, -jnp.inf)

    m = jnp.max(raw, axis=-1, keepdims=True)
    e = jnp.exp(raw - m)
    denom = jnp.sum(e, axis=-1, keepdims=True)
    px_scale = e / denom               # exact reciprocal: approx EUP rcp breaks 1e-4 rtol
    px_rate = jnp.exp(lib_ref[...]) * px_scale   # library is (TB, 1): one tiny EUP op/tile

    px_scale_ref[...] = px_scale.astype(px_scale_ref.dtype)
    px_rate_ref[...] = px_rate.astype(px_rate_ref.dtype)


def _round_up(x, m):
    return ((x + m - 1) // m) * m


def _vmem_budget_bytes():
    """~3/4 of physical VMEM: ~48 MiB on v7x (64 MiB), ~96 MiB on v5e/v6e (128 MiB)."""
    try:
        cap = pltpu.get_tpu_info().vmem_capacity_bytes
    except Exception:
        cap = 64 << 20                 # conservative fallback (v7x-sized VMEM)
    return (int(cap) * 3) // 4


def _estimate_vmem(tb, n_in_total, n_out_pad, in_bytes, out_bytes):
    w = 2 * 2 * n_in_total * n_out_pad * in_bytes      # two weight mats, double-buffered
    xin = 2 * tb * (n_in_total + 1) * in_bytes         # x + library tiles, double-buffered
    outs = 2 * 3 * tb * n_out_pad * out_bytes          # three outputs, double-buffered
    interm = 4 * tb * n_out_pad * 4                    # raw / e / px_scale / px_rate (f32)
    return w + xin + outs + interm


def _pick_batch_tile(n_in_total, n_out_pad, in_bytes, out_bytes, budget):
    tb = 2048
    while tb > 8 and _estimate_vmem(tb, n_in_total, n_out_pad, in_bytes, out_bytes) > budget:
        tb //= 2
    return max(tb, 8)


def linear_decoder_scvi_forward(z, library, cat, *, w_scale_t, w_dropout_t, n_cat,
                                out_dtype=jnp.bfloat16):
    """JAX wrapper reproducing LinearDecoderSCVI.forward (the `dispersion` arg is unused).

    z:        (B, n_input) float32
    library:  (B, 1) float32
    cat:      (B, 1) int32 categorical covariate with n_cat categories
    w_*_t:    (n_input + n_cat, n_output) float32 (transposed nn.Linear weights, bias=False)
    Returns (px_scale, px_r=None, px_rate, px_dropout).
    """
    # Covariate one-hot injection + concat (FCLayers first-layer injection).
    # TODO(synk): fold in-kernel via a scalar-prefetched row gather of W[n_input + cat]
    # to avoid materializing the concatenated x in HBM.
    one_hot = jax.nn.one_hot(cat.squeeze(-1), n_cat, dtype=z.dtype)   # (B, n_cat)
    x = jnp.concatenate([z, one_hot], axis=-1)                        # (B, n_in_total)

    B, n_in_total = x.shape
    n_output = w_scale_t.shape[1]
    n_out_pad = _round_up(n_output, 128)
    if n_out_pad != n_output:
        padc = ((0, 0), (0, n_out_pad - n_output))
        w_scale_t = jnp.pad(w_scale_t, padc)
        w_dropout_t = jnp.pad(w_dropout_t, padc)

    in_bytes = x.dtype.itemsize
    out_bytes = jnp.dtype(out_dtype).itemsize
    budget = _vmem_budget_bytes()
    tb = _pick_batch_tile(n_in_total, n_out_pad, in_bytes, out_bytes, budget)
    tb = min(tb, _round_up(B, 8))                    # don't over-tile tiny batches
    if B >= 16 and _round_up(B, tb) // tb < 2:
        # Guarantee >=2 grid steps so the "parallel" batch axis shards across v7x's 2 TCs.
        tb = _round_up((B + 1) // 2, 8)

    b_pad = _round_up(B, tb)
    if b_pad != B:
        pad = b_pad - B
        x = jnp.pad(x, ((0, pad), (0, 0)))
        library = jnp.pad(library, ((0, pad), (0, 0)))

    grid = (b_pad // tb,)
    est = _estimate_vmem(tb, n_in_total, n_out_pad, in_bytes, out_bytes)
    vmem_limit = int(min(max(est + (8 << 20), 32 << 20), budget))

    out_shapes = (
        jax.ShapeDtypeStruct((b_pad, n_out_pad), out_dtype),   # px_scale
        jax.ShapeDtypeStruct((b_pad, n_out_pad), out_dtype),   # px_rate
        jax.ShapeDtypeStruct((b_pad, n_out_pad), out_dtype),   # px_dropout
    )

    kernel = functools.partial(_decoder_kernel, n_valid=n_output)

    # Weights use a constant index_map -> VMEM-resident across grid steps.
    # (pl.Buffered(1) on these invariant blocks would reclaim one weight copy on v7x.)
    px_scale, px_rate, px_dropout = pl.pallas_call(
        kernel,
        out_shape=out_shapes,
        grid=grid,
        in_specs=[
            pl.BlockSpec((tb, n_in_total), lambda i: (i, 0)),            # x tile
            pl.BlockSpec((n_in_total, n_out_pad), lambda i: (0, 0)),     # W_scale (resident)
            pl.BlockSpec((n_in_total, n_out_pad), lambda i: (0, 0)),     # W_dropout (resident)
            pl.BlockSpec((tb, 1), lambda i: (i, 0)),                     # library tile
        ],
        out_specs=(
            pl.BlockSpec((tb, n_out_pad), lambda i: (i, 0)),
            pl.BlockSpec((tb, n_out_pad), lambda i: (i, 0)),
            pl.BlockSpec((tb, n_out_pad), lambda i: (i, 0)),
        ),
        compiler_params=pltpu.CompilerParams(
            dimension_semantics=("parallel",),
            vmem_limit_bytes=vmem_limit,
        ),
    )(x, w_scale_t, w_dropout_t, library)

    if b_pad != B or n_out_pad != n_output:
        px_scale = px_scale[:B, :n_output]
        px_rate = px_rate[:B, :n_output]
        px_dropout = px_dropout[:B, :n_output]

    px_r = None  # LinearDecoderSCVI always returns px_r = None
    return px_scale, px_r, px_rate, px_dropout


if __name__ == "__main__":
    # Small, module-consistent shapes.
    B = 8           # batch
    n_input = 32    # latent dim (z)
    n_cat = 4       # single categorical covariate with 4 categories
    n_in_total = n_input + n_cat

    key = jax.random.PRNGKey(0)
    k_z, k_lib, k_cat, k_w1, k_w2 = jax.random.split(key, 5)

    z = jax.random.normal(k_z, (B, n_input), dtype=jnp.float32)
    library = jax.random.normal(k_lib, (B, 1), dtype=jnp.float32)
    cat = jax.random.randint(k_cat, (B, 1), 0, n_cat, dtype=jnp.int32)

    bound = 1.0 / (n_in_total ** 0.5)

    def reference(w_scale_t, w_dropout_t):
        one_hot = jax.nn.one_hot(cat.squeeze(-1), n_cat, dtype=z.dtype)
        x_ref = jnp.concatenate([z, one_hot], axis=-1)
        raw_ref = jnp.dot(x_ref, w_scale_t, precision=jax.lax.Precision.HIGHEST)
        scale_ref = jax.nn.softmax(raw_ref, axis=-1)
        rate_ref = jnp.exp(library) * scale_ref
        drop_ref = jnp.dot(x_ref, w_dropout_t, precision=jax.lax.Precision.HIGHEST)
        return scale_ref, rate_ref, drop_ref

    def run_and_check(n_output, out_dtype, atol, rtol):
        # Deterministic "nn.Linear" weights (bias=False), stored pre-transposed.
        w_scale_t = jax.random.uniform(k_w1, (n_in_total, n_output), jnp.float32, -bound, bound)
        w_dropout_t = jax.random.uniform(k_w2, (n_in_total, n_output), jnp.float32, -bound, bound)

        px_scale, px_r, px_rate, px_dropout = linear_decoder_scvi_forward(
            z, library, cat, w_scale_t=w_scale_t, w_dropout_t=w_dropout_t,
            n_cat=n_cat, out_dtype=out_dtype)
        jax.block_until_ready((px_scale, px_rate, px_dropout))

        scale_ref, rate_ref, drop_ref = reference(w_scale_t, w_dropout_t)
        assert px_r is None
        assert px_scale.shape == scale_ref.shape
        assert jnp.allclose(px_scale.astype(jnp.float32), scale_ref, atol=atol, rtol=rtol)
        assert jnp.allclose(px_rate.astype(jnp.float32), rate_ref, atol=atol, rtol=rtol)
        assert jnp.allclose(px_dropout.astype(jnp.float32), drop_ref, atol=atol, rtol=rtol)

    # Lane-aligned gene dim, f32 outputs (tight check).
    run_and_check(n_output=128, out_dtype=jnp.float32, atol=1e-5, rtol=1e-4)
    # Gene dim not a multiple of 128 -> exercises lane padding + softmax masking.
    run_and_check(n_output=120, out_dtype=jnp.float32, atol=1e-5, rtol=1e-4)
    # Default bf16 writeback path (looser tolerance for the cast at the output stores).
    run_and_check(n_output=128, out_dtype=jnp.bfloat16, atol=2e-2, rtol=2e-2)

    print("KERNEL_OK")
</pallas_src>

<mosaic_0001>
module attributes {stable_mosaic.version = 11 : i64} {
  func.func @_decoder_kernel(%arg0: i32, %arg1: memref<8x36xf32, #tpu.memory_space<vmem>>, %arg2: memref<36x128xf32, #tpu.memory_space<vmem>>, %arg3: memref<36x128xf32, #tpu.memory_space<vmem>>, %arg4: memref<8x1xf32, #tpu.memory_space<vmem>>, %arg5: memref<8x128xf32, #tpu.memory_space<vmem>>, %arg6: memref<8x128xf32, #tpu.memory_space<vmem>>, %arg7: memref<8x128xf32, #tpu.memory_space<vmem>>) attributes {dimension_semantics = [#tpu.dimension_semantics<parallel>], iteration_bounds = array<i64: 1>, scalar_prefetch = 0 : i64, scratch_operands = 0 : i64, tpu.core_type = #tpu.core_type<tc>, window_params = [{transform_indices = @transform_0, window_bounds = array<i64: 8, 36>}, {pipeline_mode = #tpu.pipeline_mode<synchronous>, transform_indices = @transform_1, window_bounds = array<i64: 36, 128>}, {pipeline_mode = #tpu.pipeline_mode<synchronous>, transform_indices = @transform_2, window_bounds = array<i64: 36, 128>}, {transform_indices = @transform_3, window_bounds = array<i64: 8, 1>}, {transform_indices = @transform_4, window_bounds = array<i64: 8, 128>}, {transform_indices = @transform_5, window_bounds = array<i64: 8, 128>}, {transform_indices = @transform_6, window_bounds = array<i64: 8, 128>}]} {
    %c0 = arith.constant 0 : index
    %c0_0 = arith.constant 0 : index
    %0 = vector.load %arg1[%c0, %c0_0] : memref<8x36xf32, #tpu.memory_space<vmem>>, vector<8x36xf32>
    %c0_1 = arith.constant 0 : index
    %c0_2 = arith.constant 0 : index
    %1 = vector.load %arg3[%c0_1, %c0_2] : memref<36x128xf32, #tpu.memory_space<vmem>>, vector<36x128xf32>
    %cst = arith.constant dense<0.000000e+00> : vector<8x128xf32>
    %2 = tpu.matmul %0, %1, %cst {dimension_numbers = #tpu.dot_dimension_numbers<[1], [0], [0], [1], [0, 0, 1, 1], [], []>, precision = #tpu.contract_precision<fp32>} : vector<8x36xf32>, vector<36x128xf32>, vector<8x128xf32> -> vector<8x128xf32>
    %c0_3 = arith.constant 0 : index
    %c0_4 = arith.constant 0 : index
    %3 = vector.load %arg7[%c0_3, %c0_4] : memref<8x128xf32, #tpu.memory_space<vmem>>, vector<8x128xf32>
    tpu.vector_store %arg7[%c0_3, %c0_4], %2 {strides = array<i32>} : memref<8x128xf32, #tpu.memory_space<vmem>>, vector<8x128xf32>,
    %c0_5 = arith.constant 0 : index
    %c0_6 = arith.constant 0 : index
    %4 = vector.load %arg2[%c0_5, %c0_6] : memref<36x128xf32, #tpu.memory_space<vmem>>, vector<36x128xf32>
    %cst_7 = arith.constant dense<0.000000e+00> : vector<8x128xf32>
    %5 = tpu.matmul %0, %4, %cst_7 {dimension_numbers = #tpu.dot_dimension_numbers<[1], [0], [0], [1], [0, 0, 1, 1], [], []>, precision = #tpu.contract_precision<fp32>} : vector<8x36xf32>, vector<36x128xf32>, vector<8x128xf32> -> vector<8x128xf32>
    %cst_8 = arith.constant dense<0xFF800000> : vector<8xf32>
    %6 = vector.multi_reduction <maximumf>, %5, %cst_8 [1] : vector<8x128xf32> to vector<8xf32>
    %7 = vector.shape_cast %6 : vector<8xf32> to vector<8x1xf32>
    %8 = vector.broadcast %7 : vector<8x1xf32> to vector<8x128xf32>
    %9 = arith.subf %5, %8 : vector<8x128xf32>
    %10 = math.exp %9 : vector<8x128xf32>
    %cst_9 = arith.constant dense<0.000000e+00> : vector<8xf32>
    %11 = vector.multi_reduction <add>, %10, %cst_9 [1] : vector<8x128xf32> to vector<8xf32>
    %12 = vector.shape_cast %11 : vector<8xf32> to vector<8x1xf32>
    %13 = vector.broadcast %12 : vector<8x1xf32> to vector<8x128xf32>
    %14 = arith.divf %10, %13 : vector<8x128xf32>
    %c0_10 = arith.constant 0 : index
    %c0_11 = arith.constant 0 : index
    %15 = vector.load %arg4[%c0_10, %c0_11] : memref<8x1xf32, #tpu.memory_space<vmem>>, vector<8x1xf32>
    %16 = math.exp %15 : vector<8x1xf32>
    %17 = vector.broadcast %16 : vector<8x1xf32> to vector<8x128xf32>
    %18 = arith.mulf %17, %14 : vector<8x128xf32>
    %c0_12 = arith.constant 0 : index
    %c0_13 = arith.constant 0 : index
    %19 = vector.load %arg5[%c0_12, %c0_13] : memref<8x128xf32, #tpu.memory_space<vmem>>, vector<8x128xf32>
    tpu.vector_store %arg5[%c0_12, %c0_13], %14 {strides = array<i32>} : memref<8x128xf32, #tpu.memory_space<vmem>>, vector<8x128xf32>,
    %c0_14 = arith.constant 0 : index
    %c0_15 = arith.constant 0 : index
    %20 = vector.load %arg6[%c0_14, %c0_15] : memref<8x128xf32, #tpu.memory_space<vmem>>, vector<8x128xf32>
    tpu.vector_store %arg6[%c0_14, %c0_15], %18 {strides = array<i32>} : memref<8x128xf32, #tpu.memory_space<vmem>>, vector<8x128xf32>,
    return
  }
  func.func @transform_0(%arg0: i32) -> (i32, i32) {
    %c0_i32 = arith.constant 0 : i32
    %c0_i32_0 = arith.constant 0 : i32
    return %arg0, %c0_i32 : i32, i32
  }
  func.func @transform_1(%arg0: i32) -> (i32, i32) {
    %c0_i32 = arith.constant 0 : i32
    %c0_i32_0 = arith.constant 0 : i32
    %c0_i32_1 = arith.constant 0 : i32
    return %c0_i32, %c0_i32_0 : i32, i32
  }
  func.func @transform_2(%arg0: i32) -> (i32, i32) {
    %c0_i32 = arith.constant 0 : i32
    %c0_i32_0 = arith.constant 0 : i32
    %c0_i32_1 = arith.constant 0 : i32
    return %c0_i32, %c0_i32_0 : i32, i32
  }
  func.func @transform_3(%arg0: i32) -> (i32, i32) {
    %c0_i32 = arith.constant 0 : i32
    %c0_i32_0 = arith.constant 0 : i32
    return %arg0, %c0_i32 : i32, i32
  }
  func.func @transform_4(%arg0: i32) -> (i32, i32) {
    %c0_i32 = arith.constant 0 : i32
    %c0_i32_0 = arith.constant 0 : i32
    return %arg0, %c0_i32 : i32, i32
  }
  func.func @transform_5(%arg0: i32) -> (i32, i32) {
    %c0_i32 = arith.constant 0 : i32
    %c0_i32_0 = arith.constant 0 : i32
    return %arg0, %c0_i32 : i32, i32
  }
  func.func @transform_6(%arg0: i32) -> (i32, i32) {
    %c0_i32 = arith.constant 0 : i32
    %c0_i32_0 = arith.constant 0 : i32
    return %arg0, %c0_i32 : i32, i32
  }
}

</mosaic_0001>

<bundles_post_ra>
// kernel: tpu_custom_call.1
= control target key start
LH: loop header
LB: loop body
LE: loop exit
PB: predicated region body
PF: predicated region fallthrough
CT: control target
= control target key end

     0   :  { %12 = vsyncpa [#allocation3], 0  ;;  %s1882_s0 = inlined_call_operand.vmem [shape: f32[8,36], index: 0, kind: input, shape index: {}]   ;;  %s1883_s1 = inlined_call_operand.hbm [shape: f32[36,128], index: 1, kind: input, shape index: {}]   ;;  %s1884_s2 = inlined_call_operand.hbm [shape: f32[36,128], index: 2, kind: input, shape index: {}]   ;;  %s1885_s3 = inlined_call_operand.vmem [shape: f32[8,1], index: 3, kind: input, shape index: {}]   ;;  %s1886_s4 = inlined_call_operand.hbm [shape: f32[8,128], index: 4, kind: output, shape index: {0}]   ;;  %s1887_s5 = inlined_call_operand.hbm [shape: f32[8,128], index: 5, kind: output, shape index: {1}]   ;;  %s1888_s6 = inlined_call_operand.hbm [shape: f32[8,128], index: 6, kind: output, shape index: {2}]  }
   0x1   :  { %13 = vsyncpa [#allocation6], 0 }
   0x2   :  { %14 = vsyncpa [#allocation4], 0 }
   0x3   :  { %15 = vsyncpa [#allocation9], 0  ;;  %s1589_s21 = smov [#allocation2]   ;;  %s1471_s25 = scalar_lea.hbm %s1883_s1, 640 }
   0x4   :  { %s23_s22 = sshll.u32 %s1589_s21, 4  ;;  %p1472_p0 = scmp.ne.s32.totalorder %s1883_s1, %s1471_s25  ;;  %s24_s22 = int_to_ptr.vmem [resolvable:$true] %s23_s22 }
   0x5   :  { %p1475_p1 = scmp.lt.u32.totalorder %s1471_s25, %s1883_s1 }
   0x7   :  { %p1477_p2 = pnand %p1475_p1, %p1472_p0 }
   0x9   :  { %1480 = shalt.err (!%p1477_p2)
}
   0xa   :  { %s1481_s30 = scalar_lea.vmem %s24_s22, 640  ;;  %p1486_p4 = scmp.lt.s32.totalorder %s24_s22, %s24_s22 }
   0xb   :  { %p1482_p3 = scmp.ne.s32.totalorder %s24_s22, %s1481_s30  ;;  %p1487_p5 = scmp.lt.s32.totalorder %s1481_s30, %s1481_s30 }
   0xd   :  { %p1488_p6 = por %p1487_p5, %p1486_p4 }
   0xf   :  { %p1489_p7 = pnand %p1488_p6, %p1482_p3 }
  0x11   :  { %1492 = shalt.err (!%p1489_p7)
}
  0x12   :  { %s1590_s7 = smov 128   ;;  %s1591_s8 = smov 8  }
  0x13   :  { %29 = dma.hbm_to_vmem [thread:$0]  %s1883_s1, 640, %s24_s22, [#allocation3], %s1590_s7, %s1590_s7, %s1591_s8  }
  0x14   :  { %s1592_s11 = smov [#allocation5]   ;;  %s1493_s15 = scalar_lea.hbm %s1884_s2, 640 }
  0x15   :  { %s35_s12 = sshll.u32 %s1592_s11, 4  ;;  %p1494_p8 = scmp.ne.s32.totalorder %s1884_s2, %s1493_s15  ;;  %s36_s12 = int_to_ptr.vmem [resolvable:$true] %s35_s12 }
  0x16   :  { %p1497_p9 = scmp.lt.u32.totalorder %s1493_s15, %s1884_s2 }
  0x18   :  { %p1499_p10 = pnand %p1497_p9, %p1494_p8 }
  0x1a   :  { %1502 = shalt.err (!%p1499_p10)
}
  0x1b   :  { %s1503_s20 = scalar_lea.vmem %s36_s12, 640  ;;  %p1508_p12 = scmp.lt.s32.totalorder %s36_s12, %s36_s12 }
  0x1c   :  { %p1504_p11 = scmp.ne.s32.totalorder %s36_s12, %s1503_s20  ;;  %p1509_p13 = scmp.lt.s32.totalorder %s1503_s20, %s1503_s20 }
  0x1e   :  { %p1510_p0 = por %p1509_p13, %p1508_p12 }
  0x20   :  { %p1511_p1 = pnand %p1510_p0, %p1504_p11 }
  0x22   :  { %1514 = shalt.err (!%p1511_p1)
}
  0x23   :  { %41 = dma.hbm_to_vmem [thread:$0]  %s1884_s2, 640, %s36_s12, [#allocation6], %s1590_s7, %s1590_s7, %s1591_s8  }
  0x24   :  { %1581 = dma.done.wait [#allocation3], 640  }
  0x25   :  { %1582 = vsyncadd [#allocation3], 4294966656 }
  0x26   :  { %1583 = dma.done.wait [#allocation6], 640  }
  0x27   :  { %1584 = vsyncadd [#allocation6], 4294966656  ;;  %v1593_v0 = vmov 0.0|0.0   ;;  %vm1594_vm0 = vmmov 0   ;;  %v1595_v1 = vmov 0.0   ;;  %vm60_vm1 = vcmask 1043456  }
  0x28   :  { %1396 = vmatprep.subr.bf16.mxu1 %v1593_v0  ;;  %1292 = vmatprep.mubr.msk.f32.mxu1 %vm1594_vm0, %v1595_v1  ;;  %v563_v2 = vld [vmem:[#allocation2] sm:$0xff]  ;;  %v564_v3 = vld [vmem:[#allocation2 + $0x8] sm:$0xff]  ;;  %v565_v4 = vld [vmem:[#allocation2 + $0x10] sm:$0xff]  ;;  %vm56_vm2 = vcmask 293888   ;;  %s1597_s24 = smov [#allocation7]   ;;  %s1598_s25 = smov [#allocation8]  }
  0x29   :  { %1360 = vmatprep.subr.bf16.mxu0 %v1593_v0  ;;  %1214 = vmatprep.mubr.msk.f32.mxu0 %vm1594_vm0, %v1595_v1  ;;  %v572_v5 = vand.u32 4294901760, %v563_v2  ;;  %v575_v6 = vand.u32 4294901760, %v564_v3  ;;  %v566_v7 = vld [vmem:[#allocation2 + $0x18] sm:$0xff]  ;;  %v578_v8 = vand.u32 4294901760, %v565_v4  ;;  %v567_v9 = vld [vmem:[#allocation2 + $0x20] sm:$0xf] }
  0x2a   :  { %v581_v10 = vand.u32 4294901760, %v566_v7  ;;  %v569_v11 = vsel %vm60_vm1, %v567_v9, 0  ;;  %v50_v12 = vld [vmem:[%s1882_s0] sm:$0xff]  ;;  %v51_v31 = vld [vmem:[#allocation5] sm:$0xff]  ;;  %v52_v32 = vld [vmem:[#allocation5 + $0x8] sm:$0xff]  ;;  %s1105_s26 = sshll.u32 %s1598_s25, 4  ;;  %s1106_s26 = int_to_ptr.vmem [resolvable:$true] %s1105_s26 }
  0x2b   :  { %v1669_v13 = vpack.c.bf16 %v575_v6, %v572_v5  ;;  %v1671_v14 = vsub.f32 %v563_v2, %v572_v5  ;;  %v1673_v15 = vsub.f32 %v564_v3, %v575_v6  ;;  %v1675_v16 = vsub.f32 %v565_v4, %v578_v8  ;;  %v53_v34 = vld [vmem:[#allocation5 + $0x10] sm:$0xff]  ;;  %v54_v35 = vld [vmem:[#allocation5 + $0x18] sm:$0xff]  ;;  %v55_v2 = vld [vmem:[#allocation5 + $0x20] sm:$0xf]  ;;  %s1599_s27 = smov [#allocation10]  }
  0x2c   :  { %v1677_v17 = vpack.c.bf16 %v581_v10, %v578_v8  ;;  %v1679_v18 = vsub.f32 %v566_v7, %v581_v10  ;;  %v1681_v19 = vand.u32 4294901760, %v569_v11  ;;  %v58_v20 = vsel %vm56_vm2, %v50_v12, 0  ;;  %s1115_s28 = sshll.u32 %s1599_s27, 4  ;;  %s1839_s28 = int_to_ptr.vmem [resolvable:$true] %s1115_s28 }
  0x2d   :  { %1398 = vmatpush3.bf16.msra.mxu1 %v1669_v13  ;;  %v1685_v21 = vand.u32 4294901760, %v58_v20  ;;  %v654_v22 = vand.u32 4294901760, %v1671_v14  ;;  %v661_v23 = vand.u32 4294901760, %v1673_v15  ;;  %v668_v24 = vand.u32 4294901760, %v1675_v16 }
  0x2e   :  { %1399 = vmatprep.subr.bf16.mxu1 %v1593_v0  ;;  %v1692_v25 = vsub.f32 %v569_v11, %v1681_v19  ;;  %v675_v26 = vand.u32 4294901760, %v1679_v18  ;;  %v65_v40 = vand.u32 4294901760, %v51_v31  ;;  %v68_v41 = vand.u32 4294901760, %v52_v32 }
  0x2f   :  { %v1696_v27 = vsub.f32 %v58_v20, %v1685_v21  ;;  %v655_v28 = vsub.f32 %v1671_v14, %v654_v22  ;;  %v662_v29 = vsub.f32 %v1673_v15, %v661_v23  ;;  %v669_v30 = vsub.f32 %v1675_v16, %v668_v24 }
  0x30   :  { %v676_v33 = vsub.f32 %v1679_v18, %v675_v26  ;;  %v682_v39 = vand.u32 4294901760, %v1692_v25  ;;  %v71_v44 = vand.u32 4294901760, %v53_v34  ;;  %v74_v45 = vand.u32 4294901760, %v54_v35 }
  0x31   :  { %1401 = vmatpush3.bf16.msra.mxu1 %v1677_v17  ;;  %v1712_v36 = vand.u32 4294901760, %v1696_v27  ;;  %v656_v37 = vand.u32 4294901760, %v655_v28  ;;  %v663_v38 = vand.u32 4294901760, %v662_v29  ;;  %v670_v43 = vand.u32 4294901760, %v669_v30  ;;  %v1078_v28 = vld [vmem:[%s1885_s3] sm:$0xff]  ;;  %s1095_s3 = sshll.u32 %s1597_s24, 4  ;;  %s1096_s3 = int_to_ptr.vmem [resolvable:$true] %s1095_s3 }
  0x32   :  { %1290 = vmatprep.subr.mxu1 %v1595_v1  ;;  %v677_v47 = vand.u32 4294901760, %v676_v33  ;;  %v1718_v48 = vpack.c.bf16 %v68_v41, %v65_v40  ;;  %v1720_v49 = vsub.f32 %v51_v31, %v65_v40  ;;  %v1725_v51 = vsub.f32 %v52_v32, %v68_v41  ;;  %s1515_s29 = scalar_lea.vmem %s1096_s3, 128  ;;  %p1520_p3 = scmp.lt.s32.totalorder %s1096_s3, %s1096_s3 }
  0x33   :  { %v137_v42 = vsub.f32 %v1696_v27, %v1712_v36  ;;  %v1403_v46 = vpack.c.bf16 %v663_v38, %v656_v37  ;;  %v1727_v52 = vsub.f32 %v53_v34, %v71_v44  ;;  %v1731_v53 = vpack.c.bf16 %v74_v45, %v71_v44  ;;  %p1516_p2 = scmp.ne.s32.totalorder %s1096_s3, %s1515_s29  ;;  %p1521_p4 = scmp.lt.s32.totalorder %s1515_s29, %s1515_s29 }
  0x34   :  { %1362 = vmatpush3.bf16.msra.mxu0 %v1718_v48  ;;  %v1733_v54 = vsub.f32 %v54_v35, %v74_v45  ;;  %v1406_v55 = vpack.c.bf16 %v677_v47, %v670_v43  ;;  %v683_v56 = vsub.f32 %v1692_v25, %v682_v39  ;;  %v1409_v58 = vpack.c.bf16 %v1673_v15, %v1671_v14 }
  0x35   :  { %1291 = vmatpush3.msra.mxu1 %v1681_v19  ;;  %v1723_v50 = vand.u32 4294901760, %v137_v42  ;;  %1363 = vmatprep.subr.bf16.mxu0 %v1593_v0  ;;  %v1412_v59 = vpack.c.bf16 %v1679_v18, %v1675_v16  ;;  %v1421_v60 = vpack.c.bf16 %v661_v23, %v654_v22  ;;  %v1424_v61 = vpack.c.bf16 %v675_v26, %v668_v24  ;;  %p1522_p5 = por %p1521_p4, %p1520_p3 }
  0x36   :  { %1402 = vmatprep.subr.bf16.mxu1 %v1593_v0  ;;  %v684_v57 = vand.u32 4294901760, %v683_v56  ;;  %v147_v62 = vand.u32 4294901760, %v1720_v49  ;;  %v154_v63 = vand.u32 4294901760, %v1725_v51  ;;  %v62_v5 = vsel %vm60_vm1, %v55_v2, 0 }
  0x37   :  { %1293 = vmatmul.mubr.f32.vlgmr.msra.gmra.mrb[0].mxu1 %v1723_v50  ;;  %v77_v6 = vand.u32 4294901760, %v62_v5  ;;  %v161_v9 = vand.u32 4294901760, %v1727_v52  ;;  %v168_v10 = vand.u32 4294901760, %v1733_v54  ;;  %v1373_v11 = vpack.c.bf16 %v1725_v51, %v1720_v49  ;;  %p1523_p6 = pnand %p1522_p5, %p1516_p2 }
  0x38   :  { %1404 = vmatpush3.bf16.msra.mxu1 %v1403_v46  ;;  %1305 = vmatprep.mubr.msk.f32.mxu1 %vm1594_vm0, %v1595_v1  ;;  %v148_v3 = vsub.f32 %v1720_v49, %v147_v62  ;;  %v155_v4 = vsub.f32 %v1725_v51, %v154_v63  ;;  %v1376_v12 = vpack.c.bf16 %v1733_v54, %v1727_v52  ;;  %v1596_v29 = vmov 0  }
  0x39   :  { %1405 = vmatprep.subr.bf16.mxu1 %v1593_v0  ;;  %1365 = vmatpush3.bf16.msra.mxu0 %v1731_v53  ;;  %v174_v14 = vsub.f32 %v62_v5, %v77_v6  ;;  %v162_v16 = vsub.f32 %v1727_v52, %v161_v9  ;;  %v1388_v18 = vpack.c.bf16 %v168_v10, %v161_v9  ;;  %v1079_v30 = vmul.f32 1.442695, %v1078_v28 }
  0x3a   :  { %1212 = vmatprep.subr.mxu0 %v1595_v1  ;;  %v149_v7 = vand.u32 4294901760, %v148_v3  ;;  %v156_v8 = vand.u32 4294901760, %v155_v4  ;;  %1463 = vset.pattern.permute.xlu1 %v1596_v29 }
  0x3b   :  { %v175_v20 = vand.u32 4294901760, %v174_v14  ;;  %1464 = vset.pattern.permute.xlu0 %v1596_v29  ;;  %1465 = vpow2.f32 %v1079_v30 }
  0x3c   :  { %1407 = vmatpush3.bf16.msra.mxu1 %v1406_v55  ;;  %v1367_v15 = vpack.c.bf16 %v156_v8, %v149_v7 }
  0x3d   :  { %1303 = vmatprep.subr.mxu1 %v1595_v1  ;;  %1213 = vmatpush3.msra.mxu0 %v77_v6  ;;  %v176_v23 = vsub.f32 %v174_v14, %v175_v20 }
  0x3e   :  { %1366 = vmatprep.subr.bf16.mxu0 %v1593_v0  ;;  %1215 = vmatmul.mubr.f32.vlgmr.msra.gmra.mrb[0].mxu0 %v1723_v50 }
  0x3f   :  { %1368 = vmatpush3.bf16.msra.mxu0 %v1367_v15  ;;  %1227 = vmatprep.mubr.msk.f32.mxu0 %vm1594_vm0, %v1595_v1 }
  0x40   :  { %1304 = vmatpush3.msra.mxu1 %v684_v57  ;;  %1369 = vmatprep.subr.bf16.mxu0 %v1593_v0 }
  0x41   :  { %1408 = vmatprep.subr.bf16.mxu1 %v1593_v0  ;;  %1306 = vmatmul.mubr.f32.vlgmr.msra.gmra.mrb[0].mxu1 %v1685_v21 }
  0x42   :  { %1410 = vmatpush3.bf16.msra.mxu1 %v1409_v58  ;;  %1318 = vmatprep.mubr.msk.f32.mxu1 %vm1594_vm0, %v1595_v1 }
  0x43   :  { %1411 = vmatprep.subr.bf16.mxu1 %v1593_v0 }
  0x46   :  { %1413 = vmatpush3.bf16.msra.mxu1 %v1412_v59 }
  0x47   :  { %1316 = vmatprep.subr.mxu1 %v1595_v1 }
  0x4a   :  { %1317 = vmatpush3.msra.mxu1 %v1692_v25  ;;  %v177_v25 = vand.u32 4294901760, %v176_v23 }
  0x4b   :  { %1414 = vmatprep.subr.bf16.mxu1 %v1593_v0  ;;  %1319 = vmatmul.mubr.f32.vlgmr.msra.gmra.mrb[0].mxu1 %v1696_v27 }
  0x4c   :  { %1416 = vmatpush3.bf16.msra.mxu1 %v1669_v13  ;;  %1331 = vmatprep.mubr.msk.f32.mxu1 %vm1594_vm0, %v1595_v1 }
  0x4d   :  { %1417 = vmatprep.subr.bf16.mxu1 %v1593_v0 }
  0x50   :  { %1419 = vmatpush3.bf16.msra.mxu1 %v1677_v17 }
  0x51   :  { %1329 = vmatprep.subr.mxu1 %v1595_v1 }
  0x54   :  { %1330 = vmatpush3.msra.mxu1 %v1681_v19 }
  0x55   :  { %1420 = vmatprep.subr.bf16.mxu1 %v1593_v0  ;;  %1332 = vmatmul.mubr.f32.vlgmr.msra.gmra.mrb[0].mxu1 %v1712_v36 }
  0x56   :  { %1422 = vmatpush3.bf16.msra.mxu1 %v1421_v60  ;;  %1344 = vmatprep.mubr.msk.f32.mxu1 %vm1594_vm0, %v1595_v1 }
  0x57   :  { %1423 = vmatprep.subr.bf16.mxu1 %v1593_v0 }
  0x5a   :  { %1425 = vmatpush3.bf16.msra.mxu1 %v1424_v61 }
  0x5b   :  { %1342 = vmatprep.subr.mxu1 %v1595_v1 }
  0x5e   :  { %1343 = vmatpush3.msra.mxu1 %v682_v39 }
  0x5f   :  { %1426 = vmatprep.subr.bf16.mxu1 %v1593_v0  ;;  %1345 = vmatmul.mubr.f32.vlgmr.msra.gmra.mrb[0].mxu1 %v1685_v21 }
  0x60   :  { %1428 = vmatpush3.bf16.msra.mxu1 %v1669_v13  ;;  %1357 = vmatprep.mubr.msk.f32.mxu1 %vm1594_vm0, %v1595_v1  ;;  %v1385_v13 = vpack.c.bf16 %v154_v63, %v147_v62 }
  0x61   :  { %1429 = vmatprep.subr.bf16.mxu1 %v1593_v0 }
  0x64   :  { %1431 = vmatpush3.bf16.msra.mxu1 %v1677_v17  ;;  %v169_v17 = vsub.f32 %v1733_v54, %v168_v10 }
  0x65   :  { %1355 = vmatprep.subr.mxu1 %v1595_v1 }
  0x66   :  { %v170_v22 = vand.u32 4294901760, %v169_v17 }
  0x68   :  { %1356 = vmatpush3.msra.mxu1 %v1681_v19  ;;  %v163_v19 = vand.u32 4294901760, %v162_v16 }
  0x69   :  { %1358 = vmatmul.mubr.f32.vlgmr.msra.gmra.mrb[0].mxu1 %v1685_v21 }
  0x6a   :  { %v1370_v24 = vpack.c.bf16 %v170_v22, %v163_v19 }
  0x6c   :  { %1371 = vmatpush3.bf16.msra.mxu0 %v1370_v24 }
  0x6d   :  { %1225 = vmatprep.subr.mxu0 %v1595_v1 }
  0x70   :  { %1226 = vmatpush3.msra.mxu0 %v177_v25 }
  0x71   :  { %1372 = vmatprep.subr.bf16.mxu0 %v1593_v0  ;;  %1228 = vmatmul.mubr.f32.vlgmr.msra.gmra.mrb[0].mxu0 %v1685_v21 }
  0x72   :  { %1374 = vmatpush3.bf16.msra.mxu0 %v1373_v11  ;;  %1240 = vmatprep.mubr.msk.f32.mxu0 %vm1594_vm0, %v1595_v1 }
  0x73   :  { %1375 = vmatprep.subr.bf16.mxu0 %v1593_v0 }
  0x76   :  { %1377 = vmatpush3.bf16.msra.mxu0 %v1376_v12 }
  0x77   :  { %1238 = vmatprep.subr.mxu0 %v1595_v1 }
  0x7a   :  { %1239 = vmatpush3.msra.mxu0 %v174_v14 }
  0x7b   :  { %1378 = vmatprep.subr.bf16.mxu0 %v1593_v0  ;;  %1241 = vmatmul.mubr.f32.vlgmr.msra.gmra.mrb[0].mxu0 %v1696_v27 }
  0x7c   :  { %1380 = vmatpush3.bf16.msra.mxu0 %v1718_v48  ;;  %1253 = vmatprep.mubr.msk.f32.mxu0 %vm1594_vm0, %v1595_v1 }
  0x7d   :  { %1381 = vmatprep.subr.bf16.mxu0 %v1593_v0 }
  0x80   :  { %1383 = vmatpush3.bf16.msra.mxu0 %v1731_v53 }
  0x81   :  { %1251 = vmatprep.subr.mxu0 %v1595_v1 }
  0x84   :  { %1252 = vmatpush3.msra.mxu0 %v77_v6 }
  0x85   :  { %1384 = vmatprep.subr.bf16.mxu0 %v1593_v0  ;;  %1254 = vmatmul.mubr.f32.vlgmr.msra.gmra.mrb[0].mxu0 %v1712_v36 }
  0x86   :  { %1386 = vmatpush3.bf16.msra.mxu0 %v1385_v13  ;;  %1266 = vmatprep.mubr.msk.f32.mxu0 %vm1594_vm0, %v1595_v1 }
  0x87   :  { %1387 = vmatprep.subr.bf16.mxu0 %v1593_v0 }
  0x8a   :  { %1389 = vmatpush3.bf16.msra.mxu0 %v1388_v18 }
  0x8b   :  { %1264 = vmatprep.subr.mxu0 %v1595_v1 }
  0x8e   :  { %1265 = vmatpush3.msra.mxu0 %v175_v20 }
  0x8f   :  { %1390 = vmatprep.subr.bf16.mxu0 %v1593_v0  ;;  %1267 = vmatmul.mubr.f32.vlgmr.msra.gmra.mrb[0].mxu0 %v1685_v21 }
  0x90   :  { %1392 = vmatpush3.bf16.msra.mxu0 %v1718_v48  ;;  %1279 = vmatprep.mubr.msk.f32.mxu0 %vm1594_vm0, %v1595_v1 }
  0x91   :  { %1393 = vmatprep.subr.bf16.mxu0 %v1593_v0  ;;  %v1466_v0 = vpop.eup %1465 }
  0x92   :  { %1083 = vperm.xlu1 %1463, %v1466_v0  }
  0x94   :  { %1395 = vmatpush3.bf16.msra.mxu0 %v1731_v53 }
  0x95   :  { %1277 = vmatprep.subr.mxu0 %v1595_v1 }
  0x98   :  { %1278 = vmatpush3.msra.mxu0 %v77_v6 }
  0x99   :  { %1280 = vmatmul.mubr.f32.vlgmr.msra.gmra.mrb[0].mxu0 %v1685_v21 }
 0x111   :  { %v1084_v37 = vpop.permute.xlu1 %1083 }
 0x13c   :  { %v1065_v26 = vpop.f32.mrb[0].mxu1 }
 0x13d   :  { %1069 = vmax.xlane.f32.xlu0 %v1065_v26  ;;  %v1359_v27 = vpop.f32.mrb[1].mxu1 }
 0x16c   :  { %v558_v31 = vpop.f32.mrb[0].mxu0 }
 0x16d   :  { %562 = vst [vmem:[#allocation10] sm:$0xff] %v558_v31  ;;  %v1281_v1 = vpop.f32.mrb[1].mxu0 }
 0x1ca   :  { %v1070_v32 = vpop.xlane.xlu0 %1069 }
 0x1cb   :  { %v1071_v33 = vsub.f32 %v1065_v26, %v1070_v32 }
 0x1cd   :  { %v1072_v21 = vmul.f32 1.442695, %v1071_v33 }
 0x1cf   :  { %1467 = vpow2.f32 %v1072_v21 }
 0x1d9   :  { %v1468_v34 = vpop.eup %1467 }
 0x1da   :  { %1074 = vadd.xlane.f32.xlu0 %v1468_v34 }
 0x267   :  { %v1075_v35 = vpop.xlane.xlu0 %1074 }
 0x268   :  { %1469 = vrcp.f32 %v1075_v35 }
 0x272   :  { %v1470_v36 = vpop.eup %1469 }
 0x273   :  { %v1077_v38 = vmul.f32 %v1470_v36, %v1468_v34 }
 0x275   :  { %v1086_v39 = vmul.f32 %v1084_v37, %v1077_v38  ;;  %1087 = vst [vmem:[#allocation7] sm:$0xff] %v1077_v38 }
 0x276   :  { %1526 = shalt.err (!%p1523_p6)
}
 0x277   :  { %s1527_s8 = scalar_lea.hbm %s1886_s4, 128 }
 0x278   :  { %p1528_p7 = scmp.ne.s32.totalorder %s1886_s4, %s1527_s8  ;;  %p1531_p8 = scmp.lt.u32.totalorder %s1527_s8, %s1886_s4 }
 0x27a   :  { %p1533_p9 = pnand %p1531_p8, %p1528_p7 }
 0x27c   :  { %1536 = shalt.err (!%p1533_p9)
}
 0x27d   :  { %1098 = dma.vmem_to_hbm [thread:$0]  %s1096_s3, 128, %s1886_s4, [#allocation4]   ;;  %1088 = vst [vmem:[#allocation8] sm:$0xff] %v1086_v39 }
 0x27e   :  { %s1537_s15 = scalar_lea.vmem %s1106_s26, 128  ;;  %p1542_p11 = scmp.lt.s32.totalorder %s1106_s26, %s1106_s26 }
 0x27f   :  { %p1538_p10 = scmp.ne.s32.totalorder %s1106_s26, %s1537_s15  ;;  %p1543_p12 = scmp.lt.s32.totalorder %s1537_s15, %s1537_s15 }
 0x281   :  { %p1544_p13 = por %p1543_p12, %p1542_p11 }
 0x283   :  { %p1545_p0 = pnand %p1544_p13, %p1538_p10 }
 0x285   :  { %1548 = shalt.err (!%p1545_p0)
}
 0x286   :  { %s1549_s18 = scalar_lea.hbm %s1887_s5, 128 }
 0x287   :  { %p1550_p1 = scmp.ne.s32.totalorder %s1887_s5, %s1549_s18  ;;  %p1553_p2 = scmp.lt.u32.totalorder %s1549_s18, %s1887_s5 }
 0x289   :  { %p1555_p3 = pnand %p1553_p2, %p1550_p1 }
 0x28b   :  { %1558 = shalt.err (!%p1555_p3)
}
 0x28c   :  { %1108 = dma.vmem_to_hbm [thread:$0]  %s1106_s26, 128, %s1887_s5, [#allocation9]  }
 0x28d   :  { %s1559_s22 = scalar_lea.vmem %s1839_s28, 128  ;;  %p1564_p5 = scmp.lt.s32.totalorder %s1839_s28, %s1839_s28 }
 0x28e   :  { %p1560_p4 = scmp.ne.s32.totalorder %s1839_s28, %s1559_s22  ;;  %p1565_p6 = scmp.lt.s32.totalorder %s1559_s22, %s1559_s22 }
 0x290   :  { %p1566_p7 = por %p1565_p6, %p1564_p5 }
 0x292   :  { %p1567_p8 = pnand %p1566_p7, %p1560_p4 }
 0x294   :  { %1570 = shalt.err (!%p1567_p8)
}
 0x295   :  { %s1571_s24 = scalar_lea.hbm %s1888_s6, 128 }
 0x296   :  { %p1572_p9 = scmp.ne.s32.totalorder %s1888_s6, %s1571_s24  ;;  %p1575_p10 = scmp.lt.u32.totalorder %s1571_s24, %s1888_s6 }
 0x298   :  { %p1577_p11 = pnand %p1575_p10, %p1572_p9 }
 0x29a   :  { %1580 = shalt.err (!%p1577_p11)
}
 0x29b   :  { %1118 = dma.vmem_to_hbm [thread:$0]  %s1839_s28, 128, %s1888_s6, [#allocation9]  }
 0x29c   :  { %1585 = dma.done.wait [#allocation4], 128  }
 0x29d   :  { %1586 = vsyncadd [#allocation4], 4294967168 }
 0x29e   :  { %1587 = dma.done.wait [#allocation9], 256  }
 0x29f   :  { %1588 = vsyncadd [#allocation9], 4294967040 }
 0x2a0   :  { %1128 = vsyncpa [#allocation3], 1 }
 0x2a1   :  { %1129 = vsyncpa [#allocation6], 1 }
 0x2a2   :  { %1130 = vsyncpa [#allocation4], 1 }
 0x2a3   :  { %1131 = vsyncpa [#allocation9], 1 }

</bundles_post_ra>
